<compile_context>
chip_gen: v7x
topology: tpu7x:2x2x1
jax: 0.10.0
libtpu: 0.0.40
codegen_flags: <defaults>
</compile_context>

<pallas_src>
import functools

import jax
import jax.numpy as jnp
from jax.experimental import pallas as pl
from jax.experimental.pallas import tpu as pltpu


# --------------------------------------------------------------------------
# Fused forward kernel (one batch tile per grid step)
# --------------------------------------------------------------------------

def _discriminator_kernel(sc_ref, x_ref, w_ref, b_ref, out_ref, *, depth, in_pad):
    """sc_ref:  SMEM (depth+1,)  = [resweight_0..depth-1, b_h2]
       x_ref:   VMEM (TILE_B, in_pad)   packed & zero-padded [s|s_next|a|o]
       w_ref:   VMEM (in_pad + (depth+1)*H, H) packed weight slab
       b_ref:   VMEM (depth+3, H)       [b_enc, res_b_0.., b_h1, w_h2]
       out_ref: VMEM (1, TILE_B)        sigmoid output, batch on lanes
    """
    f32 = jnp.float32
    H = w_ref.shape[1]

    # ---- encoder: single MXU matmul over the packed input ----
    h = jnp.dot(x_ref[...], w_ref[0:in_pad, :], preferred_element_type=f32)
    h = jnp.maximum(h + b_ref[0:1, :], 0.0)

    # ---- residual stack: h = h + resweight[i] * relu(h @ W_i + b_i) ----
    for i in range(depth):                      # small static depth: unrolled
        off = in_pad + i * H                    # 8-aligned static slice (free view)
        y = (jnp.dot(h, w_ref[off:off + H, :], preferred_element_type=f32)
             + b_ref[i + 1:i + 2, :])
        h = h + sc_ref[i] * jnp.maximum(y, 0.0)   # resweight[i] from SMEM scalar path

    # ---- head: Linear(H,128) -> ReLU -> Linear(128,1) -> sigmoid ----
    off = in_pad + depth * H
    z = (jnp.dot(h, w_ref[off:off + H, :], preferred_element_type=f32)
         + b_ref[depth + 1:depth + 2, :])
    z = jnp.maximum(z, 0.0)

    # Final Linear(128,1) computed as wh2 (1,H) contracted against z's lanes,
    # producing a lane-dense (1, TILE_B) result (batch on lanes => dense vst).
    wh2 = b_ref[depth + 2:depth + 3, :]                       # (1, H)
    logit = jax.lax.dot_general(
        wh2, z, (((1,), (1,)), ((), ())), preferred_element_type=f32)  # (1, TILE_B)
    out_ref[...] = jax.nn.sigmoid(logit + sc_ref[depth]).astype(out_ref.dtype)


def discriminator_fwd(params, s, s_next, a, o, *, max_tile_b=128):
    """Full Discriminator forward in a single batch-tiled Pallas kernel."""
    w = params["w_slab"]
    b = params["b_slab"]
    sc = params["scalars"]

    H = w.shape[1]
    depth = b.shape[0] - 3
    in_pad = w.shape[0] - (depth + 1) * H
    B = s.shape[0]

    # Wrapper-side concat (cheaper than extra sub-128-K MXU passes) + K zero-pad
    # to match the packed encoder weight rows.
    x = jnp.concatenate([s, s_next, a, o], axis=1)
    in_dim = x.shape[1]
    if in_dim < in_pad:
        x = jnp.pad(x, ((0, 0), (0, in_pad - in_dim)))

    # Batch tile: lane-friendly multiple of 8, capped at max_tile_b.
    tb = min(max_tile_b, ((B + 7) // 8) * 8)
    b_pad = ((B + tb - 1) // tb) * tb
    if b_pad > B:
        x = jnp.pad(x, ((0, b_pad - B), (0, 0)))

    kernel = functools.partial(_discriminator_kernel, depth=depth, in_pad=in_pad)

    out = pl.pallas_call(
        kernel,
        out_shape=jax.ShapeDtypeStruct((1, b_pad), jnp.float32),
        grid_spec=pltpu.PrefetchScalarGridSpec(
            num_scalar_prefetch=0,
            grid=(b_pad // tb,),
            in_specs=[
                pl.BlockSpec(memory_space=pltpu.MemorySpace.SMEM),   # scalars
                pl.BlockSpec((tb, in_pad), lambda i: (i, 0)),        # batch tile
                pl.BlockSpec((w.shape[0], H), lambda i: (0, 0)),     # weight slab (resident)
                pl.BlockSpec((b.shape[0], H), lambda i: (0, 0)),     # bias slab (resident)
            ],
            out_specs=pl.BlockSpec((1, tb), lambda i: (0, i)),       # lane-dense output
        ),
        compiler_params=pltpu.CompilerParams(dimension_semantics=("parallel",)),
    )(sc, x, w, b)

    return out[0, :B][:, None]                                       # (B, 1)


# --------------------------------------------------------------------------
# Parameter initialization (deterministic, synthetic, pre-packed for the kernel)
# --------------------------------------------------------------------------

def init_discriminator(key, s_dim, a_dim, o_dim, hidden_dim=128, depth=3):
    assert hidden_dim == 128, "packed slab layout assumes hidden_dim == head width == 128"
    H = hidden_dim
    s_feat = s_dim[1]
    in_dim = 2 * s_feat + a_dim + o_dim
    in_pad = ((in_dim + 7) // 8) * 8          # sublane-aligned K for the packed encoder

    k = jax.random.split(key, 8)

    # Encoder Linear(in_dim, H), stored pre-transposed (in, out), zero-padded rows.
    enc_std = 1.0 / jnp.sqrt(in_dim)
    w_enc = enc_std * jax.random.normal(k[0], (in_dim, H), jnp.float32)
    w_enc = jnp.pad(w_enc, ((0, in_pad - in_dim), (0, 0)))
    b_enc = 0.01 * jax.random.normal(k[1], (1, H), jnp.float32)

    # depth x Linear(H, H), xavier_normal_ gain sqrt(2): std = sqrt(2/H).
    xav_std = jnp.sqrt(2.0 / H)
    res_w = xav_std * jax.random.normal(k[2], (depth, H, H), jnp.float32)
    res_b = 0.01 * jax.random.normal(k[3], (depth, H), jnp.float32)

    # Output head: Linear(H, 128) -> ReLU -> Linear(128, 1)
    w_h1 = (1.0 / jnp.sqrt(H)) * jax.random.normal(k[4], (H, 128), jnp.float32)
    b_h1 = 0.01 * jax.random.normal(k[5], (1, 128), jnp.float32)
    w_h2 = (1.0 / jnp.sqrt(128.0)) * jax.random.normal(k[6], (1, 128), jnp.float32)
    b_h2 = 0.01 * jax.random.normal(k[7], (1,), jnp.float32)

    # resweight is nn.Parameter(torch.zeros(depth)); use small nonzeros here
    # (as in a trained checkpoint) so the residual path is exercised.
    resweight = 0.1 * jax.random.normal(jax.random.fold_in(key, 99), (depth,), jnp.float32)

    # Pack: one weight slab, one bias slab (incl. w_h2 row), one scalar vector.
    w_slab = jnp.concatenate([w_enc, res_w.reshape(depth * H, H), w_h1], axis=0)
    b_slab = jnp.concatenate([b_enc, res_b, b_h1, w_h2], axis=0)   # (depth+3, 128)
    scalars = jnp.concatenate([resweight, b_h2])                    # (depth+1,)

    return {"w_slab": w_slab, "b_slab": b_slab, "scalars": scalars}


# --------------------------------------------------------------------------
# Pure-JAX reference (mirrors the PyTorch forward) for a correctness check
# --------------------------------------------------------------------------

def discriminator_ref(params, s, s_next, a, o):
    hp = jax.lax.Precision.HIGHEST
    w, b, sc = params["w_slab"], params["b_slab"], params["scalars"]
    H = w.shape[1]
    depth = b.shape[0] - 3
    in_pad = w.shape[0] - (depth + 1) * H

    x = jnp.concatenate([s, s_next, a, o], axis=1)
    h = jnp.maximum(jnp.dot(x, w[:x.shape[1], :], precision=hp) + b[0], 0.0)
    for i in range(depth):
        wi = w[in_pad + i * H: in_pad + (i + 1) * H]
        h = h + sc[i] * jnp.maximum(jnp.dot(h, wi, precision=hp) + b[1 + i], 0.0)
    w_h1 = w[in_pad + depth * H:]
    z = jnp.maximum(jnp.dot(h, w_h1, precision=hp) + b[depth + 1], 0.0)
    logit = jnp.sum(z * b[depth + 2], axis=1, keepdims=True) + sc[depth]
    return jax.nn.sigmoid(logit)


# --------------------------------------------------------------------------
# Demo
# --------------------------------------------------------------------------

if __name__ == "__main__":
    # Small shapes consistent with Discriminator(s_dim, a_dim, o_dim).
    B = 256                  # two 128-row batch tiles -> exercises the grid
    T, S_FEAT = 8, 16        # s_dim = (T, S_FEAT); forward only uses s_dim[1]
    A_DIM, O_DIM = 4, 8
    HIDDEN, DEPTH = 128, 3   # lane-aligned hidden dim; depth = module default

    key = jax.random.PRNGKey(0)
    k_s, k_sn, k_a, k_o, k_p = jax.random.split(key, 5)
    s = jax.random.normal(k_s, (B, S_FEAT), jnp.float32)
    s_next = jax.random.normal(k_sn, (B, S_FEAT), jnp.float32)
    a = jax.random.normal(k_a, (B, A_DIM), jnp.float32)
    o = jax.random.normal(k_o, (B, O_DIM), jnp.float32)

    params = init_discriminator(k_p, (T, S_FEAT), A_DIM, O_DIM, HIDDEN, DEPTH)

    out = jax.jit(discriminator_fwd)(params, s, s_next, a, o)
    out = jax.block_until_ready(out)

    assert out.shape == (B, 1), out.shape
    assert bool(jnp.all(jnp.isfinite(out)))
    assert bool(jnp.all((out >= 0.0) & (out <= 1.0)))

    ref = discriminator_ref(params, s, s_next, a, o)
    assert bool(jnp.allclose(out, ref, atol=2e-3, rtol=2e-3)), (
        float(jnp.max(jnp.abs(out - ref))))

    print("KERNEL_OK")
</pallas_src>

<mosaic_0001>
module attributes {stable_mosaic.version = 11 : i64} {
  func.func @_discriminator_kernel(%arg0: i32, %arg1: memref<4xf32, #tpu.memory_space<smem>>, %arg2: memref<128x48xf32, #tpu.memory_space<vmem>>, %arg3: memref<560x128xf32, #tpu.memory_space<vmem>>, %arg4: memref<6x128xf32, #tpu.memory_space<vmem>>, %arg5: memref<1x128xf32, #tpu.memory_space<vmem>>) attributes {dimension_semantics = [#tpu.dimension_semantics<parallel>], iteration_bounds = array<i64: 2>, scalar_prefetch = 0 : i64, scratch_operands = 0 : i64, tpu.core_type = #tpu.core_type<tc>, window_params = [{transform_indices = @transform_0, window_bounds = array<i64: 4>}, {transform_indices = @transform_1, window_bounds = array<i64: 128, 48>}, {pipeline_mode = #tpu.pipeline_mode<synchronous>, transform_indices = @transform_2, window_bounds = array<i64: 560, 128>}, {pipeline_mode = #tpu.pipeline_mode<synchronous>, transform_indices = @transform_3, window_bounds = array<i64: 6, 128>}, {transform_indices = @transform_4, window_bounds = array<i64: 1, 128>}]} {
    %c0 = arith.constant 0 : index
    %c0_0 = arith.constant 0 : index
    %0 = vector.load %arg2[%c0, %c0_0] : memref<128x48xf32, #tpu.memory_space<vmem>>, vector<128x48xf32>
    %c0_1 = arith.constant 0 : index
    %c0_2 = arith.constant 0 : index
    %1 = vector.load %arg3[%c0_1, %c0_2] : memref<560x128xf32, #tpu.memory_space<vmem>>, vector<48x128xf32>
    %cst = arith.constant dense<0.000000e+00> : vector<128x128xf32>
    %2 = tpu.matmul %0, %1, %cst {dimension_numbers = #tpu.dot_dimension_numbers<[1], [0], [0], [1], [0, 0, 1, 1], [], []>} : vector<128x48xf32>, vector<48x128xf32>, vector<128x128xf32> -> vector<128x128xf32>
    %c0_3 = arith.constant 0 : index
    %c0_4 = arith.constant 0 : index
    %3 = vector.load %arg4[%c0_3, %c0_4] : memref<6x128xf32, #tpu.memory_space<vmem>>, vector<1x128xf32>
    %4 = vector.broadcast %3 : vector<1x128xf32> to vector<128x128xf32>
    %5 = arith.addf %2, %4 : vector<128x128xf32>
    %cst_5 = arith.constant 0.000000e+00 : f32
    %6 = vector.broadcast %cst_5 : f32 to vector<128x128xf32>
    %7 = arith.maximumf %5, %6 : vector<128x128xf32>
    %c48 = arith.constant 48 : index
    %c0_6 = arith.constant 0 : index
    %8 = vector.load %arg3[%c48, %c0_6] : memref<560x128xf32, #tpu.memory_space<vmem>>, vector<128x128xf32>
    %cst_7 = arith.constant dense<0.000000e+00> : vector<128x128xf32>
    %9 = tpu.matmul %7, %8, %cst_7 {dimension_numbers = #tpu.dot_dimension_numbers<[1], [0], [0], [1], [0, 0, 1, 1], [], []>} : vector<128x128xf32>, vector<128x128xf32>, vector<128x128xf32> -> vector<128x128xf32>
    %c1 = arith.constant 1 : index
    %c0_8 = arith.constant 0 : index
    %10 = vector.load %arg4[%c1, %c0_8] : memref<6x128xf32, #tpu.memory_space<vmem>>, vector<1x128xf32>
    %11 = vector.broadcast %10 : vector<1x128xf32> to vector<128x128xf32>
    %12 = arith.addf %9, %11 : vector<128x128xf32>
    %c0_9 = arith.constant 0 : index
    %13 = memref.load %arg1[%c0_9] : memref<4xf32, #tpu.memory_space<smem>>
    %cst_10 = arith.constant 0.000000e+00 : f32
    %14 = vector.broadcast %cst_10 : f32 to vector<128x128xf32>
    %15 = arith.maximumf %12, %14 : vector<128x128xf32>
    %16 = vector.broadcast %13 : f32 to vector<128x128xf32>
    %17 = arith.mulf %16, %15 : vector<128x128xf32>
    %18 = arith.addf %7, %17 : vector<128x128xf32>
    %c176 = arith.constant 176 : index
    %c0_11 = arith.constant 0 : index
    %19 = vector.load %arg3[%c176, %c0_11] : memref<560x128xf32, #tpu.memory_space<vmem>>, vector<128x128xf32>
    %cst_12 = arith.constant dense<0.000000e+00> : vector<128x128xf32>
    %20 = tpu.matmul %18, %19, %cst_12 {dimension_numbers = #tpu.dot_dimension_numbers<[1], [0], [0], [1], [0, 0, 1, 1], [], []>} : vector<128x128xf32>, vector<128x128xf32>, vector<128x128xf32> -> vector<128x128xf32>
    %c2 = arith.constant 2 : index
    %c0_13 = arith.constant 0 : index
    %21 = vector.load %arg4[%c2, %c0_13] : memref<6x128xf32, #tpu.memory_space<vmem>>, vector<1x128xf32>
    %22 = vector.broadcast %21 : vector<1x128xf32> to vector<128x128xf32>
    %23 = arith.addf %20, %22 : vector<128x128xf32>
    %c1_14 = arith.constant 1 : index
    %24 = memref.load %arg1[%c1_14] : memref<4xf32, #tpu.memory_space<smem>>
    %cst_15 = arith.constant 0.000000e+00 : f32
    %25 = vector.broadcast %cst_15 : f32 to vector<128x128xf32>
    %26 = arith.maximumf %23, %25 : vector<128x128xf32>
    %27 = vector.broadcast %24 : f32 to vector<128x128xf32>
    %28 = arith.mulf %27, %26 : vector<128x128xf32>
    %29 = arith.addf %18, %28 : vector<128x128xf32>
    %c304 = arith.constant 304 : index
    %c0_16 = arith.constant 0 : index
    %30 = vector.load %arg3[%c304, %c0_16] : memref<560x128xf32, #tpu.memory_space<vmem>>, vector<128x128xf32>
    %cst_17 = arith.constant dense<0.000000e+00> : vector<128x128xf32>
    %31 = tpu.matmul %29, %30, %cst_17 {dimension_numbers = #tpu.dot_dimension_numbers<[1], [0], [0], [1], [0, 0, 1, 1], [], []>} : vector<128x128xf32>, vector<128x128xf32>, vector<128x128xf32> -> vector<128x128xf32>
    %c3 = arith.constant 3 : index
    %c0_18 = arith.constant 0 : index
    %32 = vector.load %arg4[%c3, %c0_18] : memref<6x128xf32, #tpu.memory_space<vmem>>, vector<1x128xf32>
    %33 = vector.broadcast %32 : vector<1x128xf32> to vector<128x128xf32>
    %34 = arith.addf %31, %33 : vector<128x128xf32>
    %c2_19 = arith.constant 2 : index
    %35 = memref.load %arg1[%c2_19] : memref<4xf32, #tpu.memory_space<smem>>
    %cst_20 = arith.constant 0.000000e+00 : f32
    %36 = vector.broadcast %cst_20 : f32 to vector<128x128xf32>
    %37 = arith.maximumf %34, %36 : vector<128x128xf32>
    %38 = vector.broadcast %35 : f32 to vector<128x128xf32>
    %39 = arith.mulf %38, %37 : vector<128x128xf32>
    %40 = arith.addf %29, %39 : vector<128x128xf32>
    %c432 = arith.constant 432 : index
    %c0_21 = arith.constant 0 : index
    %41 = vector.load %arg3[%c432, %c0_21] : memref<560x128xf32, #tpu.memory_space<vmem>>, vector<128x128xf32>
    %cst_22 = arith.constant dense<0.000000e+00> : vector<128x128xf32>
    %42 = tpu.matmul %40, %41, %cst_22 {dimension_numbers = #tpu.dot_dimension_numbers<[1], [0], [0], [1], [0, 0, 1, 1], [], []>} : vector<128x128xf32>, vector<128x128xf32>, vector<128x128xf32> -> vector<128x128xf32>
    %c4 = arith.constant 4 : index
    %c0_23 = arith.constant 0 : index
    %43 = vector.load %arg4[%c4, %c0_23] : memref<6x128xf32, #tpu.memory_space<vmem>>, vector<1x128xf32>
    %44 = vector.broadcast %43 : vector<1x128xf32> to vector<128x128xf32>
    %45 = arith.addf %42, %44 : vector<128x128xf32>
    %cst_24 = arith.constant 0.000000e+00 : f32
    %46 = vector.broadcast %cst_24 : f32 to vector<128x128xf32>
    %47 = arith.maximumf %45, %46 : vector<128x128xf32>
    %c5 = arith.constant 5 : index
    %c0_25 = arith.constant 0 : index
    %48 = vector.load %arg4[%c5, %c0_25] : memref<6x128xf32, #tpu.memory_space<vmem>>, vector<1x128xf32>
    %cst_26 = arith.constant dense<0.000000e+00> : vector<1x128xf32>
    %49 = tpu.matmul %48, %47, %cst_26 {dimension_numbers = #tpu.dot_dimension_numbers<[1], [1], [0], [0], [0, 0, 1, 0], [], []>} : vector<1x128xf32>, vector<128x128xf32>, vector<1x128xf32> -> vector<1x128xf32>
    %c3_27 = arith.constant 3 : index
    %50 = memref.load %arg1[%c3_27] : memref<4xf32, #tpu.memory_space<smem>>
    %51 = vector.broadcast %50 : f32 to vector<1x128xf32>
    %52 = arith.addf %49, %51 : vector<1x128xf32>
    %53 = arith.negf %52 : vector<1x128xf32>
    %54 = math.exp %53 : vector<1x128xf32>
    %cst_28 = arith.constant 1.000000e+00 : f32
    %55 = vector.broadcast %cst_28 : f32 to vector<1x128xf32>
    %56 = arith.addf %55, %54 : vector<1x128xf32>
    %57 = arith.divf %55, %56 : vector<1x128xf32>
    %c0_29 = arith.constant 0 : index
    %c0_30 = arith.constant 0 : index
    %58 = vector.load %arg5[%c0_29, %c0_30] : memref<1x128xf32, #tpu.memory_space<vmem>>, vector<1x128xf32>
    tpu.vector_store %arg5[%c0_29, %c0_30], %57 {strides = array<i32>} : memref<1x128xf32, #tpu.memory_space<vmem>>, vector<1x128xf32>,
    return
  }
  func.func @transform_0(%arg0: i32) -> i32 {
    %c0_i32 = arith.constant 0 : i32
    %c0_i32_0 = arith.constant 0 : i32
    return %c0_i32 : i32
  }
  func.func @transform_1(%arg0: i32) -> (i32, i32) {
    %c0_i32 = arith.constant 0 : i32
    %c0_i32_0 = arith.constant 0 : i32
    return %arg0, %c0_i32 : i32, i32
  }
  func.func @transform_2(%arg0: i32) -> (i32, i32) {
    %c0_i32 = arith.constant 0 : i32
    %c0_i32_0 = arith.constant 0 : i32
    %c0_i32_1 = arith.constant 0 : i32
    return %c0_i32, %c0_i32_0 : i32, i32
  }
  func.func @transform_3(%arg0: i32) -> (i32, i32) {
    %c0_i32 = arith.constant 0 : i32
    %c0_i32_0 = arith.constant 0 : i32
    %c0_i32_1 = arith.constant 0 : i32
    return %c0_i32, %c0_i32_0 : i32, i32
  }
  func.func @transform_4(%arg0: i32) -> (i32, i32) {
    %c0_i32 = arith.constant 0 : i32
    %c0_i32_0 = arith.constant 0 : i32
    return %c0_i32, %arg0 : i32, i32
  }
}

</mosaic_0001>

<bundles_post_ra>
// kernel: discriminator_fwd.1
= control target key start
LH: loop header
LB: loop body
LE: loop exit
PB: predicated region body
PF: predicated region fallthrough
CT: control target
= control target key end

     0   :  { %9 = vsyncpa [#allocation4], 0  ;;  %s3009_s0 = inlined_call_operand.vmem [shape: f32[4], index: 0, kind: input, shape index: {}]   ;;  %s3010_s1 = inlined_call_operand.vmem [shape: f32[256,48], index: 1, kind: input, shape index: {}]   ;;  %s3011_s2 = inlined_call_operand.vmem [shape: f32[560,128], index: 2, kind: input, shape index: {}]   ;;  %s3012_s3 = inlined_call_operand.vmem [shape: f32[6,128], index: 3, kind: input, shape index: {}]   ;;  %s3013_s4 = inlined_call_operand.hbm [shape: f32[1,256], index: 4, kind: output, shape index: {}]  }
   0x1   :  { %10 = vsyncpa [#allocation3], 0 }
   0x2   :  { %12 = vsyncpa [#allocation3 + $0x1], 0  ;;  %s2270_s15 = smov 0   ;;  %s2272_s16 = smov 0  }
   0x3   :  { %s2274_s17 = smov 0   ;;  %s2276_s18 = smov 0  }
   0x4 LB: > { %s2291_s19 = sadd.s32 4294967295, %s2238_s18   ;;  %s1438_s20 = sadd.s32 4294967294, %s2238_s18   ;;  %s2238_s18 = sphi %s2276_s18, %s3020_s18   ;;  %s2234_s17 = sphi %s2274_s17, %s3019_s17   ;;  %s2230_s16 = sphi %s2272_s16, %s3018_s16   ;;  %s2226_s15 = sphi %s2270_s15, %s3017_s15  }
   0x5   : > { %s2295_s21 = sadd.s32 1, %s2238_s18   ;;  %s114_s22 = sadd.s32 1, %s2234_s17 }
   0x6   : > { %s111_s23 = ssub.s32 %s2238_s18, %s2295_s21  ;;  %p124_p0 = scmp.ne.s32.totalorder %s2234_s17, %s2230_s16 }
   0x7   : > { %p112_p1 = scmp.eq.s32.totalorder %s111_s23, 0  ;;  %p125_p2 = scmp.eq.s32.totalorder %s2291_s19, 1 }
   0x8   : > { %p130_p3 = scmp.ne.s32.totalorder %s2230_s16, %s2226_s15  ;;  %p131_p4 = scmp.eq.s32.totalorder %s1438_s20, 1 }
   0x9   : > { %s2306_s24 = scalar_select %p112_p1, %s2234_s17, %s114_s22  }
   0xa   : > { %p2308_p5 = por %p125_p2, %p124_p0  ;;  %p2312_p6 = por %p131_p4, %p130_p3 }
   0xb   : > { %p1439_p7 = scmp.ge.s32.totalorder %s2238_s18, 1  ;;  %p138_p8 = scmp.lt.s32.totalorder %s2238_s18, 3 }
   0xc   : > { %p2114_p9 = scmp.eq.s32.totalorder %s2291_s19, 0  ;;  %s151_s30 = sshll.u32 %s3009_s0, 4  ;;  %s152_s30 = int_to_ptr.vmem [resolvable:$true] %s151_s30 }
   0xd   : > { %p2319_p10 = pnand %p1439_p7, %p138_p8  ;;  %s2157_s5 = scalar_lea.vmem %s152_s30, 16 }
   0xe   : > { %p2158_p13 = scmp.ne.s32.totalorder %s152_s30, %s2157_s5  ;;  %p2165_p3 = scmp.lt.s32.totalorder %s152_s30, %s152_s30 }
   0xf   : > { %p2106_p11 = pneg %p2319_p10  ;;  %p2166_p4 = scmp.lt.s32.totalorder %s2157_s5, %s2157_s5 }
  0x11   : > { %p2107_p12 = pnand %p2114_p9, %p2106_p11  ;;  %p2167_p7 = por %p2166_p4, %p2165_p3 }
  0x13   : > { %p2159_p0 = pneg %p2107_p12 }
  0x15   : > { %p2160_p1 = pnand %p2159_p0, %p2158_p13 }
  0x17   : > { %p2161_p2 = pneg %p2160_p1 }
  0x19   : > { %p2168_p8 = pnand %p2167_p7, %p2161_p2 }
  0x1b   : > { %2171 = shalt.err (!%p2168_p8)
}
  0x1c   : > { %s2240_s6 = smov [#allocation2]   ;;  %179 = sbr.rel (%p2319_p10) target bundleno = 1473 (0x5c1), region = 36 }
  0x1d   : > { %2109 = dma.vmem_to_smem (!%p2107_p12), %s152_s30, 16, %s2240_s6, [#allocation4]  }
  0x23   : > { %2217 = dma.done.wait (%p2114_p9), [#allocation4], 16  }
  0x24   : > { %2219 = vsyncadd (%p2114_p9), [#allocation4], 4294967280 }
  0x25   : > { %185 = sfence }
  0x26   : > { %v227_v0 = vld [vmem:[%s3011_s2] sm:$0xff]  ;;  %v228_v1 = vld [vmem:[%s3011_s2 + $0x8] sm:$0xff]  ;;  %v229_v2 = vld [vmem:[%s3011_s2 + $0x10] sm:$0xff]  ;;  %s2346_s13 = sshll.u32 %s2291_s19, 4  ;;  %vm238_vm0 = vcmask 392192   ;;  %s614_s12 = sld [smem:[#allocation2]] }
  0x27   : > { %v1936_v3 = vpack.c.bf16 %v228_v1, %v227_v0  ;;  %v230_v4 = vld [vmem:[%s3011_s2 + $0x18] sm:$0xff]  ;;  %v231_v5 = vld [vmem:[%s3011_s2 + $0x20] sm:$0xff]  ;;  %v232_v6 = vld [vmem:[%s3011_s2 + $0x28] sm:$0xff]  ;;  %p206_p9 = scmp.lt.s32.totalorder %s2346_s13, 31  ;;  %s1465_s14 = sld [smem:[#allocation2 + $0x1]]  ;;  %vm2242_vm1 = vmmov 0  }
  0x28   : > { %v1940_v7 = vpack.c.bf16 %v230_v4, %v229_v2  ;;  %v448_v8 = vld [vmem:[%s3011_s2 + $0x30] sm:$0xff]  ;;  %v449_v9 = vld [vmem:[%s3011_s2 + $0x38] sm:$0xff]  ;;  %v450_v10 = vld [vmem:[%s3011_s2 + $0x40] sm:$0xff]  ;;  %v1944_v16 = vpack.c.bf16 %v232_v6, %v231_v5  ;;  %s1469_s20 = sld [smem:[#allocation2 + $0x3]]  ;;  %s2967_s30 = scalar_lea.hbm %s3013_s4, %s2346_s13 }
  0x29   : > { %1937 = vmatprep.subr.bf16.mxu0 %v1936_v3  ;;  %s207_s8 = scalar_select %p206_p9, %s2346_s13, 31  ;;  %v1948_v11 = vpack.c.bf16 %v449_v9, %v448_v8  ;;  %v451_v12 = vld [vmem:[%s3011_s2 + $0x48] sm:$0xff]  ;;  %v452_v14 = vld [vmem:[%s3011_s2 + $0x50] sm:$0xff]  ;;  %v453_v15 = vld [vmem:[%s3011_s2 + $0x58] sm:$0xff] }
  0x2a   : > { %1939 = vmatpush3.bf16.msra.mxu0 %v1936_v3  ;;  %v1952_v13 = vpack.c.bf16 %v451_v12, %v450_v10  ;;  %v1956_v18 = vpack.c.bf16 %v453_v15, %v452_v14  ;;  %v454_v19 = vld [vmem:[%s3011_s2 + $0x60] sm:$0xff]  ;;  %v455_v20 = vld [vmem:[%s3011_s2 + $0x68] sm:$0xff]  ;;  %v456_v23 = vld [vmem:[%s3011_s2 + $0x70] sm:$0xff]  ;;  %s2244_s7 = smov [#allocation5]  }
  0x2b   : > { %1941 = vmatprep.subr.bf16.mxu0 %v1940_v7  ;;  %s1445_s22 = sshll.u32 %s207_s8, 3  ;;  %1949 = vmatprep.subr.bf16.mxu1 %v1948_v11  ;;  %v1960_v21 = vpack.c.bf16 %v455_v20, %v454_v19  ;;  %v457_v24 = vld [vmem:[%s3011_s2 + $0x78] sm:$0xff]  ;;  %v458_v28 = vld [vmem:[%s3011_s2 + $0x80] sm:$0xff]  ;;  %v459_v29 = vld [vmem:[%s3011_s2 + $0x88] sm:$0xff]  ;;  %s1467_s8 = sld [smem:[#allocation2 + $0x2]] }
  0x2c   : > { %s2380_s28 = scalar_lea.vmem %s3010_s1, %s1445_s22  ;;  %1951 = vmatpush3.bf16.msra.mxu1 %v1948_v11  ;;  %v1964_v26 = vpack.c.bf16 %v457_v24, %v456_v23  ;;  %v1968_v31 = vpack.c.bf16 %v459_v29, %v458_v28  ;;  %v460_v33 = vld [vmem:[%s3011_s2 + $0x90] sm:$0xff]  ;;  %v461_v34 = vld [vmem:[%s3011_s2 + $0x98] sm:$0xff]  ;;  %v462_v46 = vld [vmem:[%s3011_s2 + $0xa0] sm:$0xff]  ;;  %s203_s22 = sand.u32 1, %s2230_s16  }
  0x2d   : > { %v211_v17 = vld [vmem:[%s2380_s28] sm:$0xff]  ;;  %1953 = vmatprep.subr.bf16.mxu1 %v1952_v13  ;;  %v212_v22 = vld [vmem:[%s2380_s28 + $0x8] sm:$0xff]  ;;  %v213_v25 = vld [vmem:[%s2380_s28 + $0x10] sm:$0xff]  ;;  %v1972_v36 = vpack.c.bf16 %v461_v34, %v460_v33  ;;  %s204_s23 = scalar_lea.vmem [#allocation5], %s203_s22  ;;  %s1359_s5 = scalar_lea.sflag [#allocation3], %s203_s22 }
  0x2e   : > { %1943 = vmatpush3.bf16.msra.mxu0 %v1940_v7  ;;  %1653 = vmatprep.mubr.msk.f32.mxu0 %vm238_vm0, %v211_v17  ;;  %v214_v27 = vld [vmem:[%s2380_s28 + $0x18] sm:$0xff]  ;;  %v215_v30 = vld [vmem:[%s2380_s28 + $0x20] sm:$0xff]  ;;  %v216_v32 = vld [vmem:[%s2380_s28 + $0x28] sm:$0xff]  ;;  %s1371_s27 = sshll.u32 %s204_s23, 4  ;;  %s2969_s27 = int_to_ptr.vmem [resolvable:$true] %s1371_s27 }
  0x2f   : > { %1945 = vmatprep.subr.bf16.mxu0 %v1944_v16  ;;  %v217_v35 = vld [vmem:[%s2380_s28 + $0x30] sm:$0xff]  ;;  %v218_v37 = vld [vmem:[%s2380_s28 + $0x38] sm:$0xff]  ;;  %v219_v38 = vld [vmem:[%s2380_s28 + $0x40] sm:$0xff]  ;;  %s2172_s6 = scalar_lea.vmem %s2969_s27, 16 }
  0x30   : > { %1955 = vmatpush3.bf16.msra.mxu1 %v1952_v13  ;;  %v220_v39 = vld [vmem:[%s2380_s28 + $0x48] sm:$0xff]  ;;  %v221_v40 = vld [vmem:[%s2380_s28 + $0x50] sm:$0xff]  ;;  %v222_v41 = vld [vmem:[%s2380_s28 + $0x58] sm:$0xff]  ;;  %p2173_p10 = scmp.ne.s32.totalorder %s2969_s27, %s2172_s6 }
  0x31   : > { %1957 = vmatprep.subr.bf16.mxu1 %v1956_v18  ;;  %v223_v42 = vld [vmem:[%s2380_s28 + $0x60] sm:$0xff]  ;;  %v224_v43 = vld [vmem:[%s2380_s28 + $0x68] sm:$0xff]  ;;  %v225_v44 = vld [vmem:[%s2380_s28 + $0x70] sm:$0xff] }
  0x32   : > { %1947 = vmatpush3.bf16.msra.mxu0 %v1944_v16  ;;  %v226_v45 = vld [vmem:[%s2380_s28 + $0x78] sm:$0xff]  ;;  %v463_v47 = vld [vmem:[%s3011_s2 + $0xa8] sm:$0xff]  ;;  %v664_v49 = vld [vmem:[%s3011_s2 + $0xb0] sm:$0xff]  ;;  %p2174_p11 = pnand %p2173_p10, %p2308_p5 }
  0x33   : > { %v1976_v48 = vpack.c.bf16 %v463_v47, %v462_v46  ;;  %v665_v50 = vld [vmem:[%s3011_s2 + $0xb8] sm:$0xff]  ;;  %v666_v51 = vld [vmem:[%s3011_s2 + $0xc0] sm:$0xff]  ;;  %v667_v53 = vld [vmem:[%s3011_s2 + $0xc8] sm:$0xff] }
  0x34   : > { %1959 = vmatpush3.bf16.msra.mxu1 %v1956_v18  ;;  %v1980_v52 = vpack.c.bf16 %v665_v50, %v664_v49  ;;  %v1984_v54 = vpack.c.bf16 %v667_v53, %v666_v51  ;;  %v668_v55 = vld [vmem:[%s3011_s2 + $0xd0] sm:$0xff]  ;;  %v669_v56 = vld [vmem:[%s3011_s2 + $0xd8] sm:$0xff]  ;;  %v670_v58 = vld [vmem:[%s3011_s2 + $0xe0] sm:$0xff]  ;;  %p2175_p12 = pneg %p2174_p11 }
  0x35   : > { %1654 = vmatmul.mubr.msk.f32.vlgmr.msra.gmra.mrb[0].mxu0 %vm238_vm0, %v212_v22  ;;  %1961 = vmatprep.subr.bf16.mxu1 %v1960_v21  ;;  %v1988_v57 = vpack.c.bf16 %v669_v56, %v668_v55  ;;  %v671_v59 = vld [vmem:[%s3011_s2 + $0xe8] sm:$0xff]  ;;  %v672_v61 = vld [vmem:[%s3011_s2 + $0xf0] sm:$0xff]  ;;  %v673_v62 = vld [vmem:[%s3011_s2 + $0xf8] sm:$0xff] }
  0x36   : > { %1656 = vmatprep.mubr.msk.f32.mxu0 %vm238_vm0, %v213_v25  ;;  %1981 = vmatprep.subr.bf16.mxu0 %v1980_v52  ;;  %v1992_v60 = vpack.c.bf16 %v671_v59, %v670_v58  ;;  %v1996_v63 = vpack.c.bf16 %v673_v62, %v672_v61  ;;  %v674_v0 = vld [vmem:[%s3011_s2 + $0x100] sm:$0xff]  ;;  %v675_v1 = vld [vmem:[%s3011_s2 + $0x108] sm:$0xff]  ;;  %v677_v53 = vld [vmem:[%s3011_s2 + $0x118] sm:$0xff] }
  0x37   : > { %1983 = vmatpush3.bf16.msra.mxu0 %v1980_v52  ;;  %v2000_v2 = vpack.c.bf16 %v675_v1, %v674_v0  ;;  %v1446_v3 = vld [vmem:[%s3012_s3] ss:$0 sm:$0xff]  ;;  %v676_v52 = vld [vmem:[%s3011_s2 + $0x110] sm:$0xff]  ;;  %v679_v56 = vld [vmem:[%s3011_s2 + $0x128] sm:$0xff] }
  0x38   : > { %1963 = vmatpush3.bf16.msra.mxu1 %v1960_v21  ;;  %1985 = vmatprep.subr.bf16.mxu0 %v1984_v54  ;;  %v678_v55 = vld [vmem:[%s3011_s2 + $0x120] sm:$0xff]  ;;  %v880_v58 = vld [vmem:[%s3011_s2 + $0x130] sm:$0xff]  ;;  %v881_v59 = vld [vmem:[%s3011_s2 + $0x138] sm:$0xff] }
  0x39   : > { %1657 = vmatmul.mubr.msk.f32.gmra.mrb[2].mxu0 %vm238_vm0, %v214_v27  ;;  %1965 = vmatprep.subr.bf16.mxu1 %v1964_v26  ;;  %v2012_v61 = vpack.c.bf16 %v881_v59, %v880_v58  ;;  %v883_v62 = vld [vmem:[%s3011_s2 + $0x148] sm:$0xff]  ;;  %v884_v0 = vld [vmem:[%s3011_s2 + $0x150] sm:$0xff]  ;;  %v885_v1 = vld [vmem:[%s3011_s2 + $0x158] sm:$0xff] }
  0x3a   : > { %1659 = vmatprep.mubr.msk.f32.mxu0 %vm238_vm0, %v215_v30 }
  0x3b   : > { %1987 = vmatpush3.bf16.msra.mxu0 %v1984_v54  ;;  %v2004_v54 = vpack.c.bf16 %v677_v53, %v676_v52 }
  0x3c   : > { %1967 = vmatpush3.bf16.msra.mxu1 %v1964_v26  ;;  %1989 = vmatprep.subr.bf16.mxu0 %v1988_v57 }
  0x3d   : > { %1660 = vmatmul.mubr.msk.f32.gmra.mrb[4].mxu0 %vm238_vm0, %v216_v32  ;;  %1969 = vmatprep.subr.bf16.mxu1 %v1968_v31 }
  0x3e   : > { %1662 = vmatprep.mubr.msk.f32.mxu0 %vm238_vm0, %v217_v35 }
  0x3f   : > { %1991 = vmatpush3.bf16.msra.mxu0 %v1988_v57  ;;  %v2008_v57 = vpack.c.bf16 %v679_v56, %v678_v55 }
  0x40   : > { %1971 = vmatpush3.bf16.msra.mxu1 %v1968_v31  ;;  %1993 = vmatprep.subr.bf16.mxu0 %v1992_v60 }
  0x41   : > { %1663 = vmatmul.mubr.msk.f32.gmra.mrb[6].mxu0 %vm238_vm0, %v218_v37  ;;  %1973 = vmatprep.subr.bf16.mxu1 %v1972_v36 }
  0x42   : > { %1665 = vmatprep.mubr.msk.f32.mxu0 %vm238_vm0, %v219_v38 }
  0x43   : > { %1995 = vmatpush3.bf16.msra.mxu0 %v1992_v60  ;;  %v882_v60 = vld [vmem:[%s3011_s2 + $0x140] sm:$0xff] }
  0x44   : > { %1975 = vmatpush3.bf16.msra.mxu1 %v1972_v36  ;;  %1997 = vmatprep.subr.bf16.mxu0 %v1996_v63 }
  0x45   : > { %1666 = vmatmul.mubr.msk.f32.gmra.mrb[8].mxu0 %vm238_vm0, %v220_v39  ;;  %1977 = vmatprep.subr.bf16.mxu1 %v1976_v48 }
  0x46   : > { %1668 = vmatprep.mubr.msk.f32.mxu0 %vm238_vm0, %v221_v40 }
  0x47   : > { %1999 = vmatpush3.bf16.msra.mxu0 %v1996_v63  ;;  %v2016_v63 = vpack.c.bf16 %v883_v62, %v882_v60 }
  0x48   : > { %1979 = vmatpush3.bf16.msra.mxu1 %v1976_v48  ;;  %2001 = vmatprep.subr.bf16.mxu0 %v2000_v2 }
  0x49   : > { %1669 = vmatmul.mubr.msk.f32.gmra.mrb[10].mxu0 %vm238_vm0, %v222_v41  ;;  %2013 = vmatprep.subr.bf16.mxu1 %v2012_v61 }
  0x4a   : > { %1671 = vmatprep.mubr.msk.f32.mxu0 %vm238_vm0, %v223_v42 }
  0x4b   : > { %2003 = vmatpush3.bf16.msra.mxu0 %v2000_v2  ;;  %v2020_v2 = vpack.c.bf16 %v885_v1, %v884_v0 }
  0x4c   : > { %2005 = vmatprep.subr.bf16.mxu0 %v2004_v54 }
  0x4d   : > { %1672 = vmatmul.mubr.msk.f32.gmra.mrb[12].mxu0 %vm238_vm0, %v224_v43 }
  0x4e   : > { %1674 = vmatprep.mubr.msk.f32.mxu0 %vm238_vm0, %v225_v44 }
  0x4f   : > { %2007 = vmatpush3.bf16.msra.mxu0 %v2004_v54 }
  0x50   : > { %2009 = vmatprep.subr.bf16.mxu0 %v2008_v57 }
  0x51   : > { %1675 = vmatmul.mubr.msk.f32.gmra.mrb[14].mxu0 %vm238_vm0, %v226_v45 }
  0x53   : > { %2011 = vmatpush3.bf16.msra.mxu0 %v2008_v57 }
 0x108   : > { %v1655_v4 = vpop.f32.mrb[0].mxu0 }
 0x109   : > { %v2483_v5 = vadd.f32 %v1655_v4, %v1446_v3  ;;  %v353_v6 = vpop.f32.mrb[1].mxu0  ;;  %v887_v4 = vld [vmem:[%s3011_s2 + $0x168] sm:$0xff] }
 0x10a   : > { %v2485_v7 = vadd.f32 %v1446_v3, %v353_v6 }
 0x10b   : > { %v433_v10 = vmax.f32 %v2483_v5, 0.0 }
 0x10c   : > { %v432_v8 = vmax.f32 %v2485_v7, 0.0  ;;  %v1658_v9 = vpop.f32.mrb[2].mxu0 }
 0x10d   : > { %v2489_v11 = vadd.f32 %v1658_v9, %v1446_v3  ;;  %v363_v12 = vpop.f32.mrb[3].mxu0  ;;  %v888_v9 = vld [vmem:[%s3011_s2 + $0x170] sm:$0xff] }
 0x10e   : > { %v2491_v13 = vadd.f32 %v1446_v3, %v363_v12  ;;  %1709 = vmatprep.mubr.f32.mxu1 %v432_v8  ;;  %v889_v12 = vld [vmem:[%s3011_s2 + $0x178] sm:$0xff] }
 0x10f   : > { %v435_v14 = vmax.f32 %v2489_v11, 0.0  ;;  %1710 = vmatmul.mubr.f32.vlgmr.msra.gmra.mrb[0].mxu1 %v433_v10 }
 0x110   : > { %v434_v15 = vmax.f32 %v2491_v13, 0.0  ;;  %v1661_v16 = vpop.f32.mrb[4].mxu0  ;;  %2015 = vmatpush3.bf16.msra.mxu1 %v2012_v61 }
 0x111   : > { %v2499_v17 = vadd.f32 %v1661_v16, %v1446_v3  ;;  %v373_v18 = vpop.f32.mrb[5].mxu0  ;;  %2017 = vmatprep.subr.bf16.mxu1 %v2016_v63  ;;  %v2028_v16 = vpack.c.bf16 %v889_v12, %v888_v9 }
 0x112   : > { %v2501_v19 = vadd.f32 %v1446_v3, %v373_v18  ;;  %1712 = vmatprep.mubr.f32.mxu1 %v434_v15  ;;  %v890_v18 = vld [vmem:[%s3011_s2 + $0x180] sm:$0xff] }
 0x113   : > { %v437_v20 = vmax.f32 %v2499_v17, 0.0  ;;  %1713 = vmatmul.mubr.f32.gmra.mrb[2].mxu1 %v435_v14 }
 0x114   : > { %v436_v21 = vmax.f32 %v2501_v19, 0.0  ;;  %v1664_v22 = vpop.f32.mrb[6].mxu0  ;;  %2019 = vmatpush3.bf16.msra.mxu1 %v2016_v63 }
 0x115   : > { %v2509_v23 = vadd.f32 %v1664_v22, %v1446_v3  ;;  %v383_v24 = vpop.f32.mrb[7].mxu0  ;;  %2021 = vmatprep.subr.bf16.mxu1 %v2020_v2  ;;  %v891_v22 = vld [vmem:[%s3011_s2 + $0x188] sm:$0xff] }
 0x116   : > { %v2511_v25 = vadd.f32 %v1446_v3, %v383_v24  ;;  %1715 = vmatprep.mubr.f32.mxu1 %v436_v21  ;;  %v2032_v24 = vpack.c.bf16 %v891_v22, %v890_v18 }
 0x117   : > { %v439_v26 = vmax.f32 %v2509_v23, 0.0  ;;  %1716 = vmatmul.mubr.f32.gmra.mrb[4].mxu1 %v437_v20 }
 0x118   : > { %v438_v27 = vmax.f32 %v2511_v25, 0.0  ;;  %v1667_v28 = vpop.f32.mrb[8].mxu0  ;;  %2023 = vmatpush3.bf16.msra.mxu1 %v2020_v2 }
 0x119   : > { %v2519_v29 = vadd.f32 %v1667_v28, %v1446_v3  ;;  %v393_v30 = vpop.f32.mrb[9].mxu0  ;;  %v2614_v28 = vld [vmem:[%s3012_s3 + $0x1] ss:$0 sm:$0xff] }
 0x11a   : > { %v2521_v31 = vadd.f32 %v1446_v3, %v393_v30  ;;  %1718 = vmatprep.mubr.f32.mxu1 %v438_v27 }
 0x11b   : > { %v441_v32 = vmax.f32 %v2519_v29, 0.0  ;;  %1719 = vmatmul.mubr.f32.gmra.mrb[6].mxu1 %v439_v26 }
 0x11c   : > { %v440_v33 = vmax.f32 %v2521_v31, 0.0  ;;  %v1670_v34 = vpop.f32.mrb[10].mxu0 }
 0x11d   : > { %v2529_v35 = vadd.f32 %v1670_v34, %v1446_v3  ;;  %v403_v36 = vpop.f32.mrb[11].mxu0 }
 0x11e   : > { %v2531_v37 = vadd.f32 %v1446_v3, %v403_v36  ;;  %1721 = vmatprep.mubr.f32.mxu1 %v440_v33 }
 0x11f   : > { %v443_v38 = vmax.f32 %v2529_v35, 0.0  ;;  %1722 = vmatmul.mubr.f32.gmra.mrb[8].mxu1 %v441_v32 }
 0x120   : > { %v442_v39 = vmax.f32 %v2531_v37, 0.0  ;;  %v1673_v40 = vpop.f32.mrb[12].mxu0 }
 0x121   : > { %v2539_v41 = vadd.f32 %v1673_v40, %v1446_v3  ;;  %v413_v42 = vpop.f32.mrb[13].mxu0  ;;  %v2617_v40 = vstv %s614_s12 }
 0x122   : > { %v2541_v43 = vadd.f32 %v1446_v3, %v413_v42  ;;  %1724 = vmatprep.mubr.f32.mxu1 %v442_v39 }
 0x123   : > { %v445_v44 = vmax.f32 %v2539_v41, 0.0  ;;  %1725 = vmatmul.mubr.f32.gmra.mrb[10].mxu1 %v443_v38  ;;  %v892_v41 = vld [vmem:[%s3011_s2 + $0x190] sm:$0xff] }
 0x124   : > { %v444_v45 = vmax.f32 %v2541_v43, 0.0  ;;  %v1676_v46 = vpop.f32.mrb[14].mxu0 }
 0x125   : > { %v2549_v47 = vadd.f32 %v1676_v46, %v1446_v3  ;;  %v423_v48 = vpop.f32.mrb[15].mxu0 }
 0x126   : > { %v2551_v49 = vadd.f32 %v1446_v3, %v423_v48  ;;  %1727 = vmatprep.mubr.f32.mxu1 %v444_v45  ;;  %v886_v3 = vld [vmem:[%s3011_s2 + $0x160] sm:$0xff] }
 0x127   : > { %v447_v50 = vmax.f32 %v2549_v47, 0.0  ;;  %1728 = vmatmul.mubr.f32.gmra.mrb[12].mxu1 %v445_v44  ;;  %v2024_v6 = vpack.c.bf16 %v887_v4, %v886_v3  ;;  %v894_v47 = vld [vmem:[%s3011_s2 + $0x1a0] sm:$0xff] }
 0x128   : > { %v446_v51 = vmax.f32 %v2551_v49, 0.0  ;;  %v895_v49 = vld [vmem:[%s3011_s2 + $0x1a8] sm:$0xff] }
 0x129   : > { %2025 = vmatprep.subr.bf16.mxu1 %v2024_v6 }
 0x12a   : > { %1730 = vmatprep.mubr.f32.mxu1 %v446_v51  ;;  %2027 = vmatpush3.bf16.msra.mxu1 %v2024_v6 }
 0x12b   : > { %1731 = vmatmul.mubr.f32.gmra.mrb[14].mxu1 %v447_v50  ;;  %2029 = vmatprep.subr.bf16.mxu1 %v2028_v16 }
 0x12e   : > { %2031 = vmatpush3.bf16.msra.mxu1 %v2028_v16 }
 0x12f   : > { %2033 = vmatprep.subr.bf16.mxu1 %v2032_v24 }
 0x132   : > { %2035 = vmatpush3.bf16.msra.mxu1 %v2032_v24 }
 0x1e2   : > { %v1711_v30 = vpop.f32.mrb[0].mxu1 }
 0x1e3   : > { %v541_v34 = vadd.f32 %v1711_v30, %v2614_v28  ;;  %v535_v36 = vpop.f32.mrb[1].mxu1 }
 0x1e4   : > { %v536_v42 = vadd.f32 %v2614_v28, %v535_v36 }
 0x1e5   : > { %v616_v46 = vmax.f32 %v541_v34, 0.0 }
 0x1e6   : > { %v615_v48 = vmax.f32 %v536_v42, 0.0  ;;  %v1714_v52 = vpop.f32.mrb[2].mxu1 }
 0x1e7   : > { %v633_v53 = vmul.f32 %v2617_v40, %v616_v46  ;;  %v551_v54 = vadd.f32 %v1714_v52, %v2614_v28  ;;  %v545_v55 = vpop.f32.mrb[3].mxu1 }
 0x1e8   : > { %v632_v56 = vmul.f32 %v2617_v40, %v615_v48  ;;  %v546_v57 = vadd.f32 %v2614_v28, %v545_v55 }
 0x1e9   : > { %v618_v58 = vmax.f32 %v551_v54, 0.0  ;;  %v2630_v62 = vadd.f32 %v633_v53, %v433_v10 }
 0x1ea   : > { %v617_v59 = vmax.f32 %v546_v57, 0.0  ;;  %v1717_v60 = vpop.f32.mrb[4].mxu1  ;;  %v2626_v61 = vadd.f32 %v632_v56, %v432_v8 }
 0x1eb   : > { %v635_v63 = vmul.f32 %v2617_v40, %v618_v58  ;;  %v561_v0 = vadd.f32 %v1717_v60, %v2614_v28  ;;  %v555_v1 = vpop.f32.mrb[5].mxu1 }
 0x1ec   : > { %v634_v2 = vmul.f32 %v2617_v40, %v617_v59  ;;  %v556_v3 = vadd.f32 %v2614_v28, %v555_v1  ;;  %1765 = vmatprep.mubr.f32.mxu0 %v2626_v61 }
 0x1ed   : > { %v620_v4 = vmax.f32 %v561_v0, 0.0  ;;  %1766 = vmatmul.mubr.f32.vlgmr.msra.gmra.mrb[16].mxu0 %v2630_v62  ;;  %v2646_v12 = vadd.f32 %v635_v63, %v435_v14 }
 0x1ee   : > { %v619_v7 = vmax.f32 %v556_v3, 0.0  ;;  %v1720_v8 = vpop.f32.mrb[6].mxu1  ;;  %v2640_v5 = vadd.f32 %v634_v2, %v434_v15 }
 0x1ef   : > { %v637_v10 = vmul.f32 %v2617_v40, %v620_v4  ;;  %v571_v6 = vadd.f32 %v1720_v8, %v2614_v28  ;;  %v565_v9 = vpop.f32.mrb[7].mxu1 }
 0x1f0   : > { %v636_v16 = vmul.f32 %v2617_v40, %v619_v7  ;;  %v566_v18 = vadd.f32 %v2614_v28, %v565_v9  ;;  %1768 = vmatprep.mubr.f32.mxu0 %v2640_v5 }
 0x1f1   : > { %v622_v22 = vmax.f32 %v571_v6, 0.0  ;;  %1769 = vmatmul.mubr.f32.gmra.mrb[18].mxu0 %v2646_v12  ;;  %v2660_v34 = vadd.f32 %v637_v10, %v437_v20  ;;  %v1098_v6 = vld [vmem:[%s3011_s2 + $0x1c0] sm:$0xff] }
 0x1f2   : > { %v621_v13 = vmax.f32 %v566_v18, 0.0  ;;  %v1723_v15 = vpop.f32.mrb[8].mxu1  ;;  %v2654_v24 = vadd.f32 %v636_v16, %v436_v21  ;;  %v1099_v16 = vld [vmem:[%s3011_s2 + $0x1c8] sm:$0xff] }
 0x1f3   : > { %v639_v30 = vmul.f32 %v2617_v40, %v622_v22  ;;  %v581_v11 = vadd.f32 %v1723_v15, %v2614_v28  ;;  %v575_v14 = vpop.f32.mrb[9].mxu1  ;;  %v2048_v18 = vpack.c.bf16 %v1099_v16, %v1098_v6  ;;  %v1100_v22 = vld [vmem:[%s3011_s2 + $0x1d0] sm:$0xff] }
 0x1f4   : > { %v638_v36 = vmul.f32 %v2617_v40, %v621_v13  ;;  %v576_v42 = vadd.f32 %v2614_v28, %v575_v14  ;;  %1771 = vmatprep.mubr.f32.mxu0 %v2654_v24  ;;  %v1101_v13 = vld [vmem:[%s3011_s2 + $0x1d8] sm:$0xff] }
 0x1f5   : > { %v624_v46 = vmax.f32 %v581_v11, 0.0  ;;  %1772 = vmatmul.mubr.f32.gmra.mrb[20].mxu0 %v2660_v34  ;;  %v2674_v53 = vadd.f32 %v639_v30, %v439_v26  ;;  %v2052_v15 = vpack.c.bf16 %v1101_v13, %v1100_v22  ;;  %v1102_v30 = vld [vmem:[%s3011_s2 + $0x1e0] sm:$0xff]  ;;  %v1103_v11 = vld [vmem:[%s3011_s2 + $0x1e8] sm:$0xff] }
 0x1f6   : > { %v623_v19 = vmax.f32 %v576_v42, 0.0  ;;  %v1726_v21 = vpop.f32.mrb[10].mxu1  ;;  %v2668_v48 = vadd.f32 %v638_v36, %v438_v27  ;;  %v2056_v14 = vpack.c.bf16 %v1103_v11, %v1102_v30  ;;  %v1104_v36 = vld [vmem:[%s3011_s2 + $0x1f0] sm:$0xff]  ;;  %v1105_v42 = vld [vmem:[%s3011_s2 + $0x1f8] sm:$0xff] }
 0x1f7   : > { %v641_v52 = vmul.f32 %v2617_v40, %v624_v46  ;;  %v591_v17 = vadd.f32 %v1726_v21, %v2614_v28  ;;  %v585_v20 = vpop.f32.mrb[11].mxu1  ;;  %v2060_v46 = vpack.c.bf16 %v1105_v42, %v1104_v36  ;;  %v1107_v21 = vld [vmem:[%s3011_s2 + $0x208] sm:$0xff] }
 0x1f8   : > { %v640_v54 = vmul.f32 %v2617_v40, %v623_v19  ;;  %v586_v55 = vadd.f32 %v2614_v28, %v585_v20  ;;  %1774 = vmatprep.mubr.f32.mxu0 %v2668_v48  ;;  %v1106_v19 = vld [vmem:[%s3011_s2 + $0x200] sm:$0xff] }
 0x1f9   : > { %v626_v56 = vmax.f32 %v591_v17, 0.0  ;;  %1775 = vmatmul.mubr.f32.gmra.mrb[22].mxu0 %v2674_v53  ;;  %v2688_v59 = vadd.f32 %v641_v52, %v441_v32  ;;  %v2064_v52 = vpack.c.bf16 %v1107_v21, %v1106_v19  ;;  %v2781_v17 = vld [vmem:[%s3012_s3 + $0x2] ss:$0 sm:$0xff] }
 0x1fa   : > { %v625_v25 = vmax.f32 %v586_v55, 0.0  ;;  %v1729_v27 = vpop.f32.mrb[12].mxu1  ;;  %v2682_v57 = vadd.f32 %v640_v54, %v440_v33 }
 0x1fb   : > { %v643_v58 = vmul.f32 %v2617_v40, %v626_v56  ;;  %v601_v23 = vadd.f32 %v1729_v27, %v2614_v28  ;;  %v595_v26 = vpop.f32.mrb[13].mxu1  ;;  %v2784_v56 = vstv %s1465_s14 }
 0x1fc   : > { %v642_v60 = vmul.f32 %v2617_v40, %v625_v25  ;;  %v596_v63 = vadd.f32 %v2614_v28, %v595_v26  ;;  %1777 = vmatprep.mubr.f32.mxu0 %v2682_v57 }
 0x1fd   : > { %v628_v0 = vmax.f32 %v601_v23, 0.0  ;;  %1778 = vmatmul.mubr.f32.gmra.mrb[24].mxu0 %v2688_v59  ;;  %v2702_v3 = vadd.f32 %v643_v58, %v443_v38 }
 0x1fe   : > { %v627_v31 = vmax.f32 %v596_v63, 0.0  ;;  %v1732_v33 = vpop.f32.mrb[14].mxu1  ;;  %v2696_v1 = vadd.f32 %v642_v60, %v442_v39 }
 0x1ff   : > { %v645_v2 = vmul.f32 %v2617_v40, %v628_v0  ;;  %v611_v29 = vadd.f32 %v1732_v33, %v2614_v28  ;;  %v605_v32 = vpop.f32.mrb[15].mxu1 }
 0x200   : > { %v644_v4 = vmul.f32 %v2617_v40, %v627_v31  ;;  %v606_v7 = vadd.f32 %v2614_v28, %v605_v32  ;;  %1780 = vmatprep.mubr.f32.mxu0 %v2696_v1 }
 0x201   : > { %v630_v8 = vmax.f32 %v611_v29, 0.0  ;;  %1781 = vmatmul.mubr.f32.gmra.mrb[26].mxu0 %v2702_v3  ;;  %v2715_v35 = vadd.f32 %v645_v2, %v445_v44  ;;  %v893_v44 = vld [vmem:[%s3011_s2 + $0x198] sm:$0xff] }
 0x202   : > { %v629_v37 = vmax.f32 %v606_v7, 0.0  ;;  %v2710_v39 = vadd.f32 %v644_v4, %v444_v45  ;;  %v2036_v45 = vpack.c.bf16 %v893_v44, %v892_v41 }
 0x203   : > { %v647_v10 = vmul.f32 %v2617_v40, %v630_v8 }
 0x204   : > { %v646_v38 = vmul.f32 %v2617_v40, %v629_v37  ;;  %1783 = vmatprep.mubr.f32.mxu0 %v2710_v39  ;;  %2037 = vmatprep.subr.bf16.mxu1 %v2036_v45  ;;  %v1097_v40 = vld [vmem:[%s3011_s2 + $0x1b8] sm:$0xff] }
 0x205   : > { %1784 = vmatmul.mubr.f32.gmra.mrb[28].mxu0 %v2715_v35  ;;  %v2726_v43 = vadd.f32 %v647_v10, %v447_v50  ;;  %2039 = vmatpush3.bf16.msra.mxu1 %v2036_v45  ;;  %v2040_v50 = vpack.c.bf16 %v895_v49, %v894_v47 }
 0x206   : > { %v2722_v28 = vadd.f32 %v646_v38, %v446_v51  ;;  %v1096_v51 = vld [vmem:[%s3011_s2 + $0x1b0] sm:$0xff] }
 0x207   : > { %2041 = vmatprep.subr.bf16.mxu1 %v2040_v50  ;;  %v2044_v9 = vpack.c.bf16 %v1097_v40, %v1096_v51 }
 0x208   : > { %1786 = vmatprep.mubr.f32.mxu0 %v2722_v28 }
 0x209   : > { %1787 = vmatmul.mubr.f32.gmra.mrb[30].mxu0 %v2726_v43  ;;  %2043 = vmatpush3.bf16.msra.mxu1 %v2040_v50 }
 0x20a   : > { %2045 = vmatprep.subr.bf16.mxu0 %v2044_v9 }
 0x20b   : > { %2047 = vmatpush3.bf16.msra.mxu0 %v2044_v9 }
 0x20c   : > { %2049 = vmatprep.subr.bf16.mxu0 %v2048_v18 }
 0x20f   : > { %2051 = vmatpush3.bf16.msra.mxu0 %v2048_v18 }
 0x210   : > { %2053 = vmatprep.subr.bf16.mxu0 %v2052_v15 }
 0x213   : > { %2055 = vmatpush3.bf16.msra.mxu0 %v2052_v15 }
 0x214   : > { %2057 = vmatprep.subr.bf16.mxu0 %v2056_v14 }
 0x217   : > { %2059 = vmatpush3.bf16.msra.mxu0 %v2056_v14 }
 0x218   : > { %2061 = vmatprep.subr.bf16.mxu0 %v2060_v46 }
 0x21b   : > { %2063 = vmatpush3.bf16.msra.mxu0 %v2060_v46 }
 0x21c   : > { %2065 = vmatprep.subr.bf16.mxu0 %v2064_v52 }
 0x21f   : > { %2067 = vmatpush3.bf16.msra.mxu0 %v2064_v52 }
 0x2c0   : > { %v1767_v20 = vpop.f32.mrb[16].mxu0 }
 0x2c1   : > { %v757_v54 = vadd.f32 %v1767_v20, %v2781_v17  ;;  %v751_v55 = vpop.f32.mrb[17].mxu0 }
 0x2c2   : > { %v752_v25 = vadd.f32 %v2781_v17, %v751_v55 }
 0x2c3   : > { %v832_v27 = vmax.f32 %v757_v54, 0.0 }
 0x2c4   : > { %v831_v58 = vmax.f32 %v752_v25, 0.0  ;;  %v1770_v23 = vpop.f32.mrb[18].mxu0 }
 0x2c5   : > { %v849_v26 = vmul.f32 %v2784_v56, %v832_v27  ;;  %v767_v60 = vadd.f32 %v1770_v23, %v2781_v17  ;;  %v761_v63 = vpop.f32.mrb[19].mxu0 }
 0x2c6   : > { %v848_v0 = vmul.f32 %v2784_v56, %v831_v58  ;;  %v762_v31 = vadd.f32 %v2781_v17, %v761_v63 }
 0x2c7   : > { %v834_v33 = vmax.f32 %v767_v60, 0.0  ;;  %v2795_v4 = vadd.f32 %v849_v26, %v2630_v62 }
 0x2c8   : > { %v833_v2 = vmax.f32 %v762_v31, 0.0  ;;  %v1773_v29 = vpop.f32.mrb[20].mxu0  ;;  %v2792_v32 = vadd.f32 %v848_v0, %v2626_v61 }
 0x2c9   : > { %v851_v7 = vmul.f32 %v2784_v56, %v834_v33  ;;  %v777_v8 = vadd.f32 %v1773_v29, %v2781_v17  ;;  %v771_v37 = vpop.f32.mrb[21].mxu0 }
 0x2ca   : > { %v850_v10 = vmul.f32 %v2784_v56, %v833_v2  ;;  %v772_v38 = vadd.f32 %v2781_v17, %v771_v37  ;;  %1821 = vmatprep.mubr.f32.mxu1 %v2792_v32 }
 0x2cb   : > { %v836_v41 = vmax.f32 %v777_v8, 0.0  ;;  %1822 = vmatmul.mubr.f32.vlgmr.msra.gmra.mrb[16].mxu1 %v2795_v4  ;;  %v2809_v50 = vadd.f32 %v851_v7, %v2646_v12 }
 0x2cc   : > { %v835_v44 = vmax.f32 %v772_v38, 0.0  ;;  %v1776_v61 = vpop.f32.mrb[22].mxu0  ;;  %v2804_v45 = vadd.f32 %v850_v10, %v2640_v5 }
 0x2cd   : > { %v853_v62 = vmul.f32 %v2784_v56, %v836_v41  ;;  %v787_v47 = vadd.f32 %v1776_v61, %v2781_v17  ;;  %v781_v49 = vpop.f32.mrb[23].mxu0  ;;  %v2896_v61 = vld [vmem:[%s3012_s3 + $0x3] ss:$0 sm:$0xff] }
 0x2ce   : > { %v852_v51 = vmul.f32 %v2784_v56, %v835_v44  ;;  %v782_v40 = vadd.f32 %v2781_v17, %v781_v49  ;;  %1824 = vmatprep.mubr.f32.mxu1 %v2804_v45 }
 0x2cf   : > { %v838_v6 = vmax.f32 %v787_v47, 0.0  ;;  %1825 = vmatmul.mubr.f32.gmra.mrb[18].mxu1 %v2809_v50  ;;  %v2821_v13 = vadd.f32 %v853_v62, %v2660_v34 }
 0x2d0   : > { %v837_v9 = vmax.f32 %v782_v40, 0.0  ;;  %v1779_v5 = vpop.f32.mrb[24].mxu0  ;;  %v2816_v16 = vadd.f32 %v852_v51, %v2654_v24  ;;  %v2899_v51 = vstv %s1467_s8  ;;  %s2176_s8 = sshll.u32 %s2244_s7, 4  ;;  %s2177_s8 = int_to_ptr.vmem [resolvable:$false] %s2176_s8 }
 0x2d1   : > { %v855_v18 = vmul.f32 %v2784_v56, %v838_v6  ;;  %v797_v22 = vadd.f32 %v1779_v5, %v2781_v17  ;;  %v791_v12 = vpop.f32.mrb[25].mxu0  ;;  %s2178_s9 = scalar_lea.vmem %s2177_s8, 32  ;;  %p2179_p13 = scmp.lt.s32.totalorder %s2969_s27, %s2177_s8 }
 0x2d2   : > { %v854_v15 = vmul.f32 %v2784_v56, %v837_v9  ;;  %v792_v30 = vadd.f32 %v2781_v17, %v791_v12  ;;  %1827 = vmatprep.mubr.f32.mxu1 %v2816_v16  ;;  %p2180_p0 = scmp.lt.s32.totalorder %s2178_s9, %s2172_s6 }
 0x2d3   : > { %v840_v11 = vmax.f32 %v797_v22, 0.0  ;;  %1828 = vmatmul.mubr.f32.gmra.mrb[20].mxu1 %v2821_v13  ;;  %v2833_v19 = vadd.f32 %v855_v18, %v2674_v53 }
 0x2d4   : > { %v839_v14 = vmax.f32 %v792_v30, 0.0  ;;  %v1782_v24 = vpop.f32.mrb[26].mxu0  ;;  %v2828_v36 = vadd.f32 %v854_v15, %v2668_v48  ;;  %p2181_p1 = por %p2180_p0, %p2179_p13 }
 0x2d5   : > { %v857_v42 = vmul.f32 %v2784_v56, %v840_v11  ;;  %v807_v46 = vadd.f32 %v1782_v24, %v2781_v17  ;;  %v801_v34 = vpop.f32.mrb[27].mxu0 }
 0x2d6   : > { %v856_v21 = vmul.f32 %v2784_v56, %v839_v14  ;;  %v802_v52 = vadd.f32 %v2781_v17, %v801_v34  ;;  %1830 = vmatprep.mubr.f32.mxu1 %v2828_v36  ;;  %p2182_p2 = pnand %p2181_p1, %p2175_p12 }
 0x2d7   : > { %v842_v20 = vmax.f32 %v807_v46, 0.0  ;;  %1831 = vmatmul.mubr.f32.gmra.mrb[22].mxu1 %v2833_v19  ;;  %v2845_v58 = vadd.f32 %v857_v42, %v2688_v59 }
 0x2d8   : > { %v841_v54 = vmax.f32 %v802_v52, 0.0  ;;  %v1785_v48 = vpop.f32.mrb[28].mxu0  ;;  %v2840_v55 = vadd.f32 %v856_v21, %v2682_v57 }
 0x2d9   : > { %v859_v25 = vmul.f32 %v2784_v56, %v842_v20  ;;  %v817_v27 = vadd.f32 %v1785_v48, %v2781_v17  ;;  %v811_v53 = vpop.f32.mrb[29].mxu0 }
 0x2da   : > { %v858_v23 = vmul.f32 %v2784_v56, %v841_v54  ;;  %v812_v26 = vadd.f32 %v2781_v17, %v811_v53  ;;  %1833 = vmatprep.mubr.f32.mxu1 %v2840_v55 }
 0x2db   : > { %v844_v60 = vmax.f32 %v817_v27, 0.0  ;;  %1834 = vmatmul.mubr.f32.gmra.mrb[24].mxu1 %v2845_v58  ;;  %v2857_v2 = vadd.f32 %v859_v25, %v2702_v3 }
 0x2dc   : > { %v843_v63 = vmax.f32 %v812_v26, 0.0  ;;  %v1788_v57 = vpop.f32.mrb[30].mxu0  ;;  %v2852_v0 = vadd.f32 %v858_v23, %v2696_v1 }
 0x2dd   : > { %v861_v31 = vmul.f32 %v2784_v56, %v844_v60  ;;  %v827_v33 = vadd.f32 %v1788_v57, %v2781_v17  ;;  %v821_v59 = vpop.f32.mrb[31].mxu0 }
 0x2de   : > { %v860_v29 = vmul.f32 %v2784_v56, %v843_v63  ;;  %v822_v7 = vadd.f32 %v2781_v17, %v821_v59  ;;  %1836 = vmatprep.mubr.f32.mxu1 %v2852_v0 }
 0x2df   : > { %v846_v8 = vmax.f32 %v827_v33, 0.0  ;;  %1837 = vmatmul.mubr.f32.gmra.mrb[26].mxu1 %v2857_v2  ;;  %v2868_v38 = vadd.f32 %v861_v31, %v2715_v35  ;;  %v1109_v35 = vld [vmem:[%s3011_s2 + $0x218] sm:$0xff] }
 0x2e0   : > { %v845_v37 = vmax.f32 %v822_v7, 0.0  ;;  %v2864_v1 = vadd.f32 %v860_v29, %v2710_v39  ;;  %v1108_v39 = vld [vmem:[%s3011_s2 + $0x210] sm:$0xff] }
 0x2e1   : > { %v863_v10 = vmul.f32 %v2784_v56, %v846_v8 }
 0x2e2   : > { %v862_v3 = vmul.f32 %v2784_v56, %v845_v37  ;;  %1839 = vmatprep.mubr.f32.mxu1 %v2864_v1  ;;  %v2068_v56 = vpack.c.bf16 %v1109_v35, %v1108_v39 }
 0x2e3   : > { %1840 = vmatmul.mubr.f32.gmra.mrb[28].mxu1 %v2868_v38  ;;  %v2877_v41 = vadd.f32 %v863_v10, %v2726_v43  ;;  %v1111_v43 = vld [vmem:[%s3011_s2 + $0x228] sm:$0xff] }
 0x2e4   : > { %v2874_v17 = vadd.f32 %v862_v3, %v2722_v28  ;;  %2069 = vmatprep.subr.bf16.mxu0 %v2068_v56  ;;  %v1110_v28 = vld [vmem:[%s3011_s2 + $0x220] sm:$0xff] }
 0x2e5   : > { %2071 = vmatpush3.bf16.msra.mxu0 %v2068_v56  ;;  %v2072_v44 = vpack.c.bf16 %v1111_v43, %v1110_v28 }
 0x2e6   : > { %1842 = vmatprep.mubr.f32.mxu1 %v2874_v17 }
 0x2e7   : > { %1843 = vmatmul.mubr.f32.gmra.mrb[30].mxu1 %v2877_v41  ;;  %2073 = vmatprep.subr.bf16.mxu0 %v2072_v44 }
 0x2e9   : > { %2075 = vmatpush3.bf16.msra.mxu0 %v2072_v44 }
 0x39e   : > { %v1823_v62 = vpop.f32.mrb[16].mxu1 }
 0x39f   : > { %v973_v47 = vadd.f32 %v1823_v62, %v2896_v61  ;;  %v967_v49 = vpop.f32.mrb[17].mxu1 }
 0x3a0   : > { %v968_v40 = vadd.f32 %v2896_v61, %v967_v49 }
 0x3a1   : > { %v1048_v6 = vmax.f32 %v973_v47, 0.0 }
 0x3a2   : > { %v1047_v9 = vmax.f32 %v968_v40, 0.0  ;;  %v1826_v5 = vpop.f32.mrb[18].mxu1 }
 0x3a3   : > { %v1065_v18 = vmul.f32 %v2899_v51, %v1048_v6  ;;  %v983_v22 = vadd.f32 %v1826_v5, %v2896_v61  ;;  %v977_v12 = vpop.f32.mrb[19].mxu1 }
 0x3a4   : > { %v1064_v15 = vmul.f32 %v2899_v51, %v1047_v9  ;;  %v978_v30 = vadd.f32 %v2896_v61, %v977_v12 }
 0x3a5   : > { %v1050_v11 = vmax.f32 %v983_v22, 0.0  ;;  %v1081_v46 = vadd.f32 %v1065_v18, %v2795_v4 }
 0x3a6   : > { %v1049_v14 = vmax.f32 %v978_v30, 0.0  ;;  %v1829_v24 = vpop.f32.mrb[20].mxu1  ;;  %v1080_v42 = vadd.f32 %v1064_v15, %v2792_v32 }
 0x3a7   : > { %v1067_v34 = vmul.f32 %v2899_v51, %v1050_v11  ;;  %v993_v21 = vadd.f32 %v1829_v24, %v2896_v61  ;;  %v987_v52 = vpop.f32.mrb[21].mxu1 }
 0x3a8   : > { %v1066_v20 = vmul.f32 %v2899_v51, %v1049_v14  ;;  %v988_v54 = vadd.f32 %v2896_v61, %v987_v52  ;;  %1877 = vmatprep.mubr.f32.mxu0 %v1080_v42 }
 0x3a9   : > { %v1052_v48 = vmax.f32 %v993_v21, 0.0  ;;  %1878 = vmatmul.mubr.f32.vlgmr.msra.gmra.mrb[32].mxu0 %v1081_v46  ;;  %v1083_v26 = vadd.f32 %v1067_v34, %v2809_v50 }
 0x3aa   : > { %v1051_v25 = vmax.f32 %v988_v54, 0.0  ;;  %v1832_v27 = vpop.f32.mrb[22].mxu1  ;;  %v1082_v53 = vadd.f32 %v1066_v20, %v2804_v45 }
 0x3ab   : > { %v1069_v32 = vmul.f32 %v2899_v51, %v1052_v48  ;;  %v1003_v4 = vadd.f32 %v1832_v27, %v2896_v61  ;;  %v997_v23 = vpop.f32.mrb[23].mxu1  ;;  %v2243_v48 = vmov 0.0  }
 0x3ac   : > { %v1068_v60 = vmul.f32 %v2899_v51, %v1051_v25  ;;  %v998_v63 = vadd.f32 %v2896_v61, %v997_v23  ;;  %1880 = vmatprep.mubr.f32.mxu0 %v1082_v53  ;;  %1933 = vmatprep.mubr.msk.f32.mxu1 %vm2242_vm1, %v2243_v48 }
 0x3ad   : > { %v1054_v57 = vmax.f32 %v1003_v4, 0.0  ;;  %1881 = vmatmul.mubr.f32.gmra.mrb[34].mxu0 %v1083_v26  ;;  %v1085_v8 = vadd.f32 %v1069_v32, %v2821_v13 }
 0x3ae   : > { %v1053_v31 = vmax.f32 %v998_v63, 0.0  ;;  %v1835_v33 = vpop.f32.mrb[24].mxu1  ;;  %v1084_v59 = vadd.f32 %v1068_v60, %v2816_v16 }
 0x3af   : > { %v1071_v45 = vmul.f32 %v2899_v51, %v1054_v57  ;;  %v1013_v29 = vadd.f32 %v1835_v33, %v2896_v61  ;;  %v1007_v7 = vpop.f32.mrb[25].mxu1 }
 0x3b0   : > { %v1070_v50 = vmul.f32 %v2899_v51, %v1053_v31  ;;  %v1008_v37 = vadd.f32 %v2896_v61, %v1007_v7  ;;  %1883 = vmatprep.mubr.f32.mxu0 %v1084_v59 }
 0x3b1   : > { %v1056_v10 = vmax.f32 %v1013_v29, 0.0  ;;  %1884 = vmatmul.mubr.f32.gmra.mrb[36].mxu0 %v1085_v8  ;;  %v1087_v43 = vadd.f32 %v1071_v45, %v2833_v19 }
 0x3b2   : > { %v1055_v3 = vmax.f32 %v1008_v37, 0.0  ;;  %v1838_v39 = vpop.f32.mrb[26].mxu1  ;;  %v1086_v35 = vadd.f32 %v1070_v50, %v2828_v36 }
 0x3b3   : > { %v1073_v16 = vmul.f32 %v2899_v51, %v1056_v10  ;;  %v1023_v56 = vadd.f32 %v1838_v39, %v2896_v61  ;;  %v1017_v28 = vpop.f32.mrb[27].mxu1 }
 0x3b4   : > { %v1072_v13 = vmul.f32 %v2899_v51, %v1055_v3  ;;  %v1018_v44 = vadd.f32 %v2896_v61, %v1017_v28  ;;  %1886 = vmatprep.mubr.f32.mxu0 %v1086_v35 }
 0x3b5   : > { %v1058_v62 = vmax.f32 %v1023_v56, 0.0  ;;  %1887 = vmatmul.mubr.f32.gmra.mrb[38].mxu0 %v1087_v43  ;;  %v1089_v5 = vadd.f32 %v1073_v16, %v2845_v58 }
 0x3b6   : > { %v1057_v47 = vmax.f32 %v1018_v44, 0.0  ;;  %v1841_v49 = vpop.f32.mrb[28].mxu1  ;;  %v1088_v40 = vadd.f32 %v1072_v13, %v2840_v55 }
 0x3b7   : > { %v1075_v36 = vmul.f32 %v2899_v51, %v1058_v62  ;;  %v1033_v6 = vadd.f32 %v1841_v49, %v2896_v61  ;;  %v1027_v9 = vpop.f32.mrb[29].mxu1 }
 0x3b8   : > { %v1074_v19 = vmul.f32 %v2899_v51, %v1057_v47  ;;  %v1028_v18 = vadd.f32 %v2896_v61, %v1027_v9  ;;  %1889 = vmatprep.mubr.f32.mxu0 %v1088_v40 }
 0x3b9   : > { %v1060_v22 = vmax.f32 %v1033_v6, 0.0  ;;  %1890 = vmatmul.mubr.f32.gmra.mrb[40].mxu0 %v1089_v5  ;;  %v1091_v24 = vadd.f32 %v1075_v36, %v2857_v2 }
 0x3ba   : > { %v1059_v12 = vmax.f32 %v1028_v18, 0.0  ;;  %v1844_v15 = vpop.f32.mrb[30].mxu1  ;;  %v1090_v30 = vadd.f32 %v1074_v19, %v2852_v0 }
 0x3bb   : > { %v1077_v55 = vmul.f32 %v2899_v51, %v1060_v22  ;;  %v1043_v11 = vadd.f32 %v1844_v15, %v2896_v61  ;;  %v1037_v14 = vpop.f32.mrb[31].mxu1 }
 0x3bc   : > { %v1076_v58 = vmul.f32 %v2899_v51, %v1059_v12  ;;  %v1038_v42 = vadd.f32 %v2896_v61, %v1037_v14  ;;  %1892 = vmatprep.mubr.f32.mxu0 %v1090_v30  ;;  %v2241_v61 = vmov 0.0|0.0  }
 0x3bd   : > { %v1062_v46 = vmax.f32 %v1043_v11, 0.0  ;;  %1893 = vmatmul.mubr.f32.gmra.mrb[42].mxu0 %v1091_v24  ;;  %v1093_v0 = vadd.f32 %v1077_v55, %v2868_v38  ;;  %2076 = vmatprep.subr.bf16.mxu1 %v2241_v61 }
 0x3be   : > { %v1061_v34 = vmax.f32 %v1038_v42, 0.0  ;;  %v1092_v21 = vadd.f32 %v1076_v58, %v2864_v1  ;;  %v1468_v1 = vld [vmem:[%s3012_s3 + $0x4] ss:$0 sm:$0xff] }
 0x3bf   : > { %v1079_v52 = vmul.f32 %v2899_v51, %v1062_v46 }
 0x3c0   : > { %v1078_v20 = vmul.f32 %v2899_v51, %v1061_v34  ;;  %1895 = vmatprep.mubr.f32.mxu0 %v1092_v21 }
 0x3c1   : > { %1896 = vmatmul.mubr.f32.gmra.mrb[44].mxu0 %v1093_v0  ;;  %v1095_v54 = vadd.f32 %v1079_v52, %v2877_v41  ;;  %v1278_v52 = vld [vmem:[%s3012_s3 + $0x5] sm:$0x1]  ;;  %v1280_v0 = vstv %s1469_s20 }
 0x3c2   : > { %v1094_v2 = vadd.f32 %v1078_v20, %v2874_v17 }
 0x3c4   : > { %1898 = vmatprep.mubr.f32.mxu0 %v1094_v2 }
 0x3c5   : > { %1899 = vmatmul.mubr.f32.gmra.mrb[46].mxu0 %v1095_v54 }
 0x47c   : > { %v1879_v38 = vpop.f32.mrb[32].mxu0 }
 0x47d   : > { %v1189_v51 = vadd.f32 %v1879_v38, %v1468_v1  ;;  %v1183_v25 = vpop.f32.mrb[33].mxu0 }
 0x47e   : > { %v1184_v27 = vadd.f32 %v1468_v1, %v1183_v25 }
 0x47f   : > { %v1263_v53 = vmax.f32 %v1189_v51, 0.0 }
 0x480   : > { %v1262_v17 = vmax.f32 %v1184_v27, 0.0  ;;  %v1882_v32 = vpop.f32.mrb[34].mxu0 }
 0x481   : > { %v1199_v41 = vadd.f32 %v1882_v32, %v1468_v1  ;;  %v1193_v4 = vpop.f32.mrb[35].mxu0 }
 0x482   : > { %v2077_v23 = vpack.c.bf16 %v1263_v53, %v1262_v17  ;;  %v1194_v26 = vadd.f32 %v1468_v1, %v1193_v4 }
 0x483   : > { %v1265_v60 = vmax.f32 %v1199_v41, 0.0 }
 0x484   : > { %v1264_v63 = vmax.f32 %v1194_v26, 0.0  ;;  %v1885_v57 = vpop.f32.mrb[36].mxu0  ;;  %2078 = vmatpush3.bf16.xpose.msra.mxu1 %v2077_v23 }
 0x485   : > { %v1209_v31 = vadd.f32 %v1885_v57, %v1468_v1  ;;  %v1203_v33 = vpop.f32.mrb[37].mxu0  ;;  %2079 = vmatprep.subr.bf16.mxu1 %v2241_v61 }
 0x486   : > { %v2080_v59 = vpack.c.bf16 %v1265_v60, %v1264_v63  ;;  %v1204_v45 = vadd.f32 %v1468_v1, %v1203_v33 }
 0x487   : > { %v1267_v29 = vmax.f32 %v1209_v31, 0.0 }
 0x488   : > { %v1266_v7 = vmax.f32 %v1204_v45, 0.0  ;;  %v1888_v8 = vpop.f32.mrb[38].mxu0 }
 0x489   : > { %v1219_v50 = vadd.f32 %v1888_v8, %v1468_v1  ;;  %v1213_v37 = vpop.f32.mrb[39].mxu0 }
 0x48a   : > { %v2083_v10 = vpack.c.bf16 %v1267_v29, %v1266_v7  ;;  %v1214_v3 = vadd.f32 %v1468_v1, %v1213_v37 }
 0x48b   : > { %v1269_v39 = vmax.f32 %v1219_v50, 0.0 }
 0x48c   : > { %v1268_v35 = vmax.f32 %v1214_v3, 0.0  ;;  %v1891_v16 = vpop.f32.mrb[40].mxu0  ;;  %2081 = vmatpush3.bf16.xpose.msra.mxu1 %v2080_v59 }
 0x48d   : > { %v1229_v56 = vadd.f32 %v1891_v16, %v1468_v1  ;;  %v1223_v28 = vpop.f32.mrb[41].mxu0  ;;  %2082 = vmatprep.subr.bf16.mxu1 %v2241_v61 }
 0x48e   : > { %v2086_v43 = vpack.c.bf16 %v1269_v39, %v1268_v35  ;;  %v1224_v13 = vadd.f32 %v1468_v1, %v1223_v28 }
 0x48f   : > { %v1271_v44 = vmax.f32 %v1229_v56, 0.0 }
 0x490   : > { %v1270_v62 = vmax.f32 %v1224_v13, 0.0  ;;  %v1894_v47 = vpop.f32.mrb[42].mxu0 }
 0x491   : > { %v1239_v49 = vadd.f32 %v1894_v47, %v1468_v1  ;;  %v1233_v40 = vpop.f32.mrb[43].mxu0 }
 0x492   : > { %v2089_v36 = vpack.c.bf16 %v1271_v44, %v1270_v62  ;;  %v1234_v6 = vadd.f32 %v1468_v1, %v1233_v40 }
 0x493   : > { %v1273_v9 = vmax.f32 %v1239_v49, 0.0 }
 0x494   : > { %v1272_v5 = vmax.f32 %v1234_v6, 0.0  ;;  %v1897_v19 = vpop.f32.mrb[44].mxu0  ;;  %2084 = vmatpush3.bf16.xpose.msra.mxu1 %v2083_v10 }
 0x495   : > { %v1249_v18 = vadd.f32 %v1897_v19, %v1468_v1  ;;  %v1243_v22 = vpop.f32.mrb[45].mxu0  ;;  %2085 = vmatprep.subr.bf16.mxu1 %v2241_v61 }
 0x496   : > { %v2092_v12 = vpack.c.bf16 %v1273_v9, %v1272_v5  ;;  %v1244_v15 = vadd.f32 %v1468_v1, %v1243_v22 }
 0x497   : > { %v1275_v30 = vmax.f32 %v1249_v18, 0.0 }
 0x498   : > { %v1274_v55 = vmax.f32 %v1244_v15, 0.0  ;;  %v1900_v11 = vpop.f32.mrb[46].mxu0 }
 0x499   : > { %v1259_v14 = vadd.f32 %v1900_v11, %v1468_v1  ;;  %v1253_v24 = vpop.f32.mrb[47].mxu0 }
 0x49a   : > { %v2095_v58 = vpack.c.bf16 %v1275_v30, %v1274_v55  ;;  %v1254_v42 = vadd.f32 %v1468_v1, %v1253_v24 }
 0x49b   : > { %v1277_v46 = vmax.f32 %v1259_v14, 0.0 }
 0x49c   : > { %v1276_v34 = vmax.f32 %v1254_v42, 0.0  ;;  %2087 = vmatpush3.bf16.xpose.msra.mxu1 %v2086_v43 }
 0x49d   : > { %2088 = vmatprep.subr.bf16.mxu1 %v2241_v61 }
 0x49e   : > { %v2098_v21 = vpack.c.bf16 %v1277_v46, %v1276_v34 }
 0x4a4   : > { %2090 = vmatpush3.bf16.xpose.msra.mxu1 %v2089_v36 }
 0x4a5   : > { %2091 = vmatprep.subr.bf16.mxu1 %v2241_v61 }
 0x4ac   : > { %2093 = vmatpush3.bf16.xpose.msra.mxu1 %v2092_v12 }
 0x4ad   : > { %2094 = vmatprep.subr.bf16.mxu1 %v2241_v61 }
 0x4b4   : > { %2096 = vmatpush3.bf16.xpose.msra.mxu1 %v2095_v58 }
 0x4b5   : > { %2097 = vmatprep.subr.bf16.mxu1 %v2241_v61 }
 0x4bc   : > { %2099 = vmatpush3.bf16.xpose.msra.mxu1 %v2098_v21 }
 0x4c3   : > { %1934 = vmatmul.mubr.f32.vlgmr.msra.gmra.mrb[32].mxu1 %v1278_v52 }
 0x596   : > { %v1347_v20 = vpop.f32.mrb[32].mxu1 }
 0x597   : > { %v1348_v2 = vadd.f32 %v1347_v20, %v1280_v0  ;;  %v1935_v54 = vpop.f32.mrb[33].mxu1 }
 0x599   : > { %v1470_v48 = vmul.f32 -1.442695, %v1348_v2 }
 0x59b   : > { %2153 = vpow2.f32 %v1470_v48 }
 0x5a5   : > { %v2154_v1 = vpop.eup %2153 }
 0x5a6   : > { %v1354_v38 = vadd.f32 1.0, %v2154_v1 }
 0x5a8   : > { %2155 = vrcp.f32 %v1354_v38 }
 0x5b2   : > { %v2156_v61 = vpop.eup %2155 }
 0x5b3   : > { %1357 = vst [vmem:[%s204_s23] sm:$0x1] %v2156_v61 }
 0x5b4   : > { %2185 = shalt.err (!%p2182_p2)
}
 0x5b5   : > { %s2186_s13 = scalar_lea.hbm %s2967_s30, 16  ;;  %s2190_s11 = scalar_lea.hbm %s3013_s4, 32 }
 0x5b6   : > { %p2187_p3 = scmp.ne.s32.totalorder %s2967_s30, %s2186_s13  ;;  %p2191_p8 = scmp.lt.u32.totalorder %s2967_s30, %s3013_s4 }
 0x5b7   : > { %p2192_p9 = scmp.lt.u32.totalorder %s2190_s11, %s2186_s13  ;;  %p2194_p11 = scmp.lt.u32.totalorder %s2186_s13, %s2967_s30 }
 0x5b8   : > { %p2188_p4 = pnand %p2187_p3, %p2308_p5 }
 0x5b9   : > { %p2193_p10 = por %p2192_p9, %p2191_p8 }
 0x5ba   : > { %p2189_p7 = pneg %p2188_p4 }
 0x5bb   : > { %p2195_p12 = por %p2194_p11, %p2193_p10 }
 0x5bd   : > { %p2196_p13 = pnand %p2195_p12, %p2189_p7 }
 0x5bf   : > { %2199 = shalt.err (!%p2196_p13)
}
 0x5c0   : > { %2104 = dma.vmem_to_hbm [thread:$0]  (%p2308_p5), %s2969_s27, 16, %s2967_s30, %s1359_s5  }
 0x5c1 PF: > { %p2116_p0 = scmp.ge.s32.totalorder %s2238_s18, 2  ;;  %s1383_s20 = sand.u32 1, %s2226_s15  }
 0x5c2   : > { %s1384_s22 = scalar_lea.sflag [#allocation3], %s1383_s20 }
 0x5c3   : > { %p2111_p1 = pnand %p2116_p0, %p2312_p6 }
 0x5c5   : > { %2221 = dma.done.wait (!%p2111_p1), %s1384_s22, 16  }
 0x5c6   : > { %2223 = vsyncadd (!%p2111_p1), %s1384_s22, 4294967280  ;;  %p15_p2 = scmp.ge.s32.totalorder %s2295_s21, 4   ;;  %s3017_s15 = smov %s2230_s16 }
 0x5c7   : > { %s3018_s16 = smov %s2234_s17  ;;  %s3019_s17 = smov %s2306_s24 }
 0x5c8   : > { %s3020_s18 = smov %s2295_s21  ;;  %17 = sbr.rel (!%p15_p2) target bundleno = 4 (0x4), region = 76 }
 0x5cf   :  { %1388 = vsyncpa [#allocation3], 1 }
 0x5d0   :  { %1390 = vsyncpa [#allocation3 + $0x1], 1 }
 0x5d1   :  { %1391 = vsyncpa [#allocation4], 1 }
 0x5d2   :  { %1393 = vsyncpa [#allocation4 + $0x1], 1 }

</bundles_post_ra>
